<compile_context>
chip_gen: v7x
topology: tpu7x:2x2x1
jax: 0.10.0
libtpu: 0.0.40
codegen_flags: <defaults>
</compile_context>

<pallas_src>
import functools

import jax
import jax.numpy as jnp
from jax.experimental import pallas as pl
from jax.experimental.pallas import tpu as pltpu


def calculate_padding(kernel_size, stride):
    # Usual "same-downsample" convention (e.g. k=4, s=2 -> pad=1, out = in/stride).
    return (kernel_size - stride) // 2


def _cdiv(a, b):
    return -(-a // b)


def _round_up(x, m):
    return _cdiv(x, m) * m


_MAX_TM = 2048               # lane-axis tile cap; multiple of 128
_FINAL_PALLAS_MIN_M = 512    # below this the final conv runs as plain XLA


def _vmem_capacity_bytes():
    try:
        return int(pltpu.get_tpu_info().vmem_capacity_bytes)
    except Exception:        # unknown part -> assume smallest (v7x per-TC, 64 MiB)
        return 64 << 20


_VMEM_CAP = _vmem_capacity_bytes()
_VMEM_CLAMP = max(16 << 20, int(0.75 * _VMEM_CAP))   # ~48 MiB v7x, ~96 MiB v5e/v6e


def _tile_m(m):
    """Pick (m_pad, tm): tm a multiple of 128, minimal zero-padding of M."""
    m128 = _round_up(max(m, 1), 128)
    n_tiles = _cdiv(m128, _MAX_TM)
    tm = 128 * _cdiv(m128 // 128, n_tiles)
    return tm * n_tiles, tm


def _compiler_params(semantics, vmem_need_bytes):
    limit = int(min(_VMEM_CLAMP, max(16 << 20, vmem_need_bytes + (8 << 20))))
    return pltpu.CompilerParams(dimension_semantics=semantics,
                                vmem_limit_bytes=limit)


def _im2col_cm(x, kh, kw, stride, pad_h, pad_w):
    """Channel-major im2col.  x: [C, B, H, W] -> [kh*kw*C, B*Ho*Wo] (K order: kh,kw,C)."""
    C, B, H, W = x.shape
    xp = jnp.pad(x, ((0, 0), (0, 0), (pad_h, pad_h), (pad_w, pad_w)))
    Ho = (H + 2 * pad_h - kh) // stride + 1
    Wo = (W + 2 * pad_w - kw) // stride + 1
    rows = []
    for i in range(kh):
        for j in range(kw):
            rows.append(
                xp[:, :, i:i + stride * Ho:stride, j:j + stride * Wo:stride]
                .reshape(C, B * Ho * Wo))
    return jnp.concatenate(rows, axis=0), (B, Ho, Wo)


# --------------------------- Pallas kernels ---------------------------------


def _fused_conv_bn_lrelu_kernel(p_ref, w_ref, g_ref, beta_ref, o_ref,
                                y_vmem, sum_ref, ssq_ref, *, m_true, eps):
    ph = pl.program_id(0)     # 0: matmul + batch stats, 1: BN + LeakyReLU
    j = pl.program_id(1)      # M tile index

    @pl.when((ph == 0) & (j == 0))
    def _():
        sum_ref[...] = jnp.zeros_like(sum_ref)
        ssq_ref[...] = jnp.zeros_like(ssq_ref)

    @pl.when(ph == 0)
    def _():
        # No conv bias: it is exactly absorbed by the BN mean subtraction, and the
        # zero-padded M columns then contribute exactly 0 to both sums.
        y = jnp.dot(w_ref[...], p_ref[...], preferred_element_type=jnp.float32)
        y_vmem[j] = y                                   # f32 copy kept in VMEM only
        sum_ref[...] += jnp.sum(y, axis=1, keepdims=True)
        ssq_ref[...] += jnp.sum(y * y, axis=1, keepdims=True)

    @pl.when(ph == 1)
    def _():
        inv_m = 1.0 / float(m_true)
        mean = sum_ref[...] * inv_m
        var = ssq_ref[...] * inv_m - mean * mean        # biased batch var (train-mode BN)
        scale = g_ref[...] * jax.lax.rsqrt(jnp.maximum(var, 0.0) + eps)
        shift = beta_ref[...] - scale * mean
        z = y_vmem[j] * scale + shift                   # f32 epilogue math
        o_ref[...] = jnp.where(z > 0, z, 0.2 * z).astype(o_ref.dtype)


def _conv_stats_kernel(p_ref, w_ref, y_ref, stats_ref):
    # fallback pass 1: matmul, bf16 intermediate, per-channel sum/sumsq accumulators
    y = jnp.dot(w_ref[...], p_ref[...], preferred_element_type=jnp.float32)
    y_ref[...] = y.astype(y_ref.dtype)

    @pl.when(pl.program_id(0) == 0)
    def _():
        stats_ref[...] = jnp.zeros_like(stats_ref)

    s1 = jnp.sum(y, axis=1, keepdims=True)
    s2 = jnp.sum(y * y, axis=1, keepdims=True)
    stats_ref[...] += jnp.concatenate([s1, s2], axis=1)


def _bn_lrelu_kernel(y_ref, stats_ref, g_ref, beta_ref, o_ref, *, m_true, eps):
    # fallback pass 2: normalize with global batch stats + affine + LeakyReLU(0.2)
    s = stats_ref[...]
    inv_m = 1.0 / float(m_true)
    mean = s[:, 0:1] * inv_m
    var = s[:, 1:2] * inv_m - mean * mean
    scale = g_ref[...] * jax.lax.rsqrt(jnp.maximum(var, 0.0) + eps)
    shift = beta_ref[...] - scale * mean
    z = y_ref[...].astype(jnp.float32) * scale + shift    # f32 math (v5e: no bf16 VPU)
    o_ref[...] = jnp.where(z > 0, z, 0.2 * z).astype(o_ref.dtype)


def _conv_sigmoid_kernel(p_ref, w_ref, b_ref, o_ref):
    y = jnp.dot(w_ref[...], p_ref[...], preferred_element_type=jnp.float32)
    y = y + b_ref[...]
    s = pl.reciprocal(1.0 + jnp.exp(-y), approx=True)     # EUP slot; clamp the approx
    o_ref[...] = jnp.clip(s, 0.0, 1.0)


# --------------------------- layer wrappers ----------------------------------


def _conv_bn_lrelu(patches_km, wmat, gamma, beta, eps=1e-5):
    """patches_km: [K, M]; wmat: [Cout, K]. Returns lane-dense activations [Cout, M] bf16."""
    kdim, m_true = patches_km.shape
    cout = wmat.shape[0]
    m_pad, tm = _tile_m(m_true)
    nm = m_pad // tm

    p_t = jnp.pad(patches_km.astype(jnp.bfloat16), ((0, 0), (0, m_pad - m_true)))
    w_bf = wmat.astype(jnp.bfloat16)
    g2 = gamma.reshape(cout, 1).astype(jnp.float32)
    b2 = beta.reshape(cout, 1).astype(jnp.float32)

    tile_bytes = 2 * (kdim * tm * 2 + cout * kdim * 2 + 2 * cout * 4 + cout * tm * 2)
    y_scratch_bytes = nm * cout * tm * 4 + 2 * cout * 4

    if tile_bytes + y_scratch_bytes + (8 << 20) <= _VMEM_CLAMP:
        # fused single-call path: y never leaves VMEM.
        z = pl.pallas_call(
            functools.partial(_fused_conv_bn_lrelu_kernel, m_true=m_true, eps=eps),
            out_shape=jax.ShapeDtypeStruct((cout, m_pad), jnp.bfloat16),
            grid=(2, nm),
            in_specs=[
                pl.BlockSpec((kdim, tm), lambda ph, j: (0, j * (1 - ph))),
                pl.BlockSpec((cout, kdim), lambda ph, j: (0, 0)),
                pl.BlockSpec((cout, 1), lambda ph, j: (0, 0)),
                pl.BlockSpec((cout, 1), lambda ph, j: (0, 0)),
            ],
            out_specs=pl.BlockSpec((cout, tm), lambda ph, j: (0, j * ph)),
            scratch_shapes=[pltpu.VMEM((nm, cout, tm), jnp.float32),
                            pltpu.VMEM((cout, 1), jnp.float32),
                            pltpu.VMEM((cout, 1), jnp.float32)],
            compiler_params=_compiler_params(("arbitrary", "arbitrary"),
                                             tile_bytes + y_scratch_bytes),
        )(p_t, w_bf, g2, b2)
        return z[:, :m_true]

    # fallback for huge maps: two calls with a bf16 intermediate (half the old
    # f32 round-trip traffic).
    grid = (nm,)
    y, stats = pl.pallas_call(
        _conv_stats_kernel,
        out_shape=(jax.ShapeDtypeStruct((cout, m_pad), jnp.bfloat16),
                   jax.ShapeDtypeStruct((cout, 2), jnp.float32)),
        grid=grid,
        in_specs=[pl.BlockSpec((kdim, tm), lambda i: (0, i)),
                  pl.BlockSpec((cout, kdim), lambda i: (0, 0))],
        out_specs=(pl.BlockSpec((cout, tm), lambda i: (0, i)),
                   pl.BlockSpec((cout, 2), lambda i: (0, 0))),
        compiler_params=_compiler_params(("arbitrary",), tile_bytes),
    )(p_t, w_bf)

    z = pl.pallas_call(
        functools.partial(_bn_lrelu_kernel, m_true=m_true, eps=eps),
        out_shape=jax.ShapeDtypeStruct((cout, m_pad), jnp.bfloat16),
        grid=grid,
        in_specs=[pl.BlockSpec((cout, tm), lambda i: (0, i)),
                  pl.BlockSpec((cout, 2), lambda i: (0, 0)),
                  pl.BlockSpec((cout, 1), lambda i: (0, 0)),
                  pl.BlockSpec((cout, 1), lambda i: (0, 0))],
        out_specs=pl.BlockSpec((cout, tm), lambda i: (0, i)),
        compiler_params=_compiler_params(("parallel",), tile_bytes),
    )(y, stats, g2, b2)
    return z[:, :m_true]


def _conv_sigmoid(patches_km, wmat, bias):
    """patches_km: [K, M]; wmat: [1, K]. Returns flattened sigmoid scores [M] f32."""
    kdim, m_true = patches_km.shape
    cout = wmat.shape[0]                                   # 1

    if m_true < _FINAL_PALLAS_MIN_M:
        # Tiny final map (e.g. the (8,7) valid conv leaves a 1x2 grid): a Pallas
        # launch would be >95% padding + pipeline overhead; plain XLA is cheaper.
        y = jnp.dot(wmat.astype(jnp.float32), patches_km.astype(jnp.float32))
        return jax.nn.sigmoid(y + bias.reshape(cout, 1)).reshape(-1)

    m_pad, tm = _tile_m(m_true)
    p_t = jnp.pad(patches_km.astype(jnp.bfloat16), ((0, 0), (0, m_pad - m_true)))
    w_bf = wmat.astype(jnp.bfloat16)
    b2 = bias.reshape(cout, 1).astype(jnp.float32)
    tile_bytes = 2 * (kdim * tm * 2 + cout * kdim * 2 + cout * 4 + cout * tm * 4)
    out = pl.pallas_call(
        _conv_sigmoid_kernel,
        out_shape=jax.ShapeDtypeStruct((cout, m_pad), jnp.float32),
        grid=(m_pad // tm,),
        in_specs=[pl.BlockSpec((kdim, tm), lambda i: (0, i)),
                  pl.BlockSpec((cout, kdim), lambda i: (0, 0)),
                  pl.BlockSpec((cout, 1), lambda i: (0, 0))],
        out_specs=pl.BlockSpec((cout, tm), lambda i: (0, i)),
        compiler_params=_compiler_params(("parallel",), tile_bytes),
    )(p_t, w_bf, b2)
    return out[:, :m_true].reshape(-1)


# --------------------------- model glue ---------------------------------------


def init_params(key, config):
    """Deterministic synthetic params mirroring the PyTorch __init__ shapes."""
    fs, ks = config['feature_sizes'], config['kernel_size']
    params = {'conv_bn': [], 'final': None}
    for i in range(len(fs) - 1):
        cin = 6 if i == 0 else fs[i]
        cout, k = fs[i + 1], ks[i]
        key, k1, k2 = jax.random.split(key, 3)
        w = 0.1 * jax.random.normal(k1, (cout, cin, k, k), jnp.float32)
        b = 0.01 * jax.random.normal(k2, (cout,), jnp.float32)  # absorbed by BN; unused
        gamma = jnp.ones((cout,), jnp.float32)   # BatchNorm2d default affine init
        beta = jnp.zeros((cout,), jnp.float32)
        params['conv_bn'].append((w, b, gamma, beta))
    key, k1, k2 = jax.random.split(key, 3)
    wf = 0.1 * jax.random.normal(k1, (1, fs[-1], 8, 7), jnp.float32)
    bf = 0.01 * jax.random.normal(k2, (1,), jnp.float32)
    params['final'] = (wf, bf)
    return params


def frame_discriminator(x, starting_frame, params, config):
    """
    x:              [B, C, H, W]  (NCHW, like the PyTorch module)
    starting_frame: [1, C, H, W]
    returns: flattened sigmoid scores (matches the module's .view(-1)).
    Training-mode BatchNorm (batch statistics), the PyTorch module's default mode.
    """
    B = x.shape[0]
    sf = jnp.broadcast_to(starting_frame, (B,) + starting_frame.shape[1:])
    h = jnp.concatenate([x, sf], axis=1)                 # [B, 6, H, W]
    # channel-major [C, B, H, W] end to end: no per-layer layout transposes.
    h = jnp.transpose(h, (1, 0, 2, 3)).astype(jnp.bfloat16)

    stride = config['stride']
    for i, (w, _b, gamma, beta) in enumerate(params['conv_bn']):
        k = config['kernel_size'][i]
        pad = calculate_padding(k, stride)
        patches, (B_, Ho, Wo) = _im2col_cm(h, k, k, stride, pad, pad)   # [K, M]
        cout, cin = w.shape[0], w.shape[1]
        wmat = jnp.transpose(w, (0, 2, 3, 1)).reshape(cout, k * k * cin)  # (kh,kw,Cin)
        z = _conv_bn_lrelu(patches, wmat, gamma, beta)   # [Cout, M] bf16
        h = z.reshape(cout, B_, Ho, Wo)                  # stays channel-major

    wf, bf = params['final']
    kh, kw = wf.shape[2], wf.shape[3]                    # (8, 7), valid conv, stride 1
    patches, _ = _im2col_cm(h, kh, kw, 1, 0, 0)
    wmat = jnp.transpose(wf, (0, 2, 3, 1)).reshape(1, kh * kw * wf.shape[1])
    return _conv_sigmoid(patches, wmat, bf)              # flattened like .view(-1)


if __name__ == "__main__":
    config = {
        'feature_sizes': [6, 8, 16],   # first entry unused for layer-0 input (forced to 6)
        'kernel_size': [4, 4],
        'stride': 2,
    }
    key = jax.random.PRNGKey(0)
    key, kx, ks, kp = jax.random.split(key, 4)

    # Small shapes consistent with the module (RGB images; two stride-2 downsamples
    # leave an 8x8 map for the final (8,7) valid conv -> 1x2 scores per image).
    x = jax.random.normal(kx, (2, 3, 32, 32), jnp.float32)               # [B, C, H, W]
    starting_frame = jax.random.normal(ks, (1, 3, 32, 32), jnp.float32)  # [1, C, H, W]

    params = init_params(kp, config)

    fwd = jax.jit(lambda xx, sf: frame_discriminator(xx, sf, params, config))
    out = jax.block_until_ready(fwd(x, starting_frame))

    assert out.shape == (2 * 1 * 1 * 2,), out.shape
    assert bool(jnp.all(jnp.isfinite(out)))
    assert bool(jnp.all((out >= 0.0) & (out <= 1.0)))
    print("KERNEL_OK")
</pallas_src>

<mosaic_0001>
module attributes {stable_mosaic.version = 11 : i64} {
  func.func @_fused_conv_bn_lrelu_kernel(%arg0: i32, %arg1: i32, %arg2: memref<96x512xbf16, #tpu.memory_space<vmem>>, %arg3: memref<8x96xbf16, #tpu.memory_space<vmem>>, %arg4: memref<8x1xf32, #tpu.memory_space<vmem>>, %arg5: memref<8x1xf32, #tpu.memory_space<vmem>>, %arg6: memref<8x512xbf16, #tpu.memory_space<vmem>>, %arg7: memref<1x8x512xf32, #tpu.memory_space<vmem>>, %arg8: memref<8x1xf32, #tpu.memory_space<vmem>>, %arg9: memref<8x1xf32, #tpu.memory_space<vmem>>) attributes {dimension_semantics = [#tpu.dimension_semantics<arbitrary>, #tpu.dimension_semantics<arbitrary>], iteration_bounds = array<i64: 2, 1>, scalar_prefetch = 0 : i64, scratch_operands = 3 : i64, tpu.core_type = #tpu.core_type<tc>, window_params = [{transform_indices = @transform_0, window_bounds = array<i64: 96, 512>}, {pipeline_mode = #tpu.pipeline_mode<synchronous>, transform_indices = @transform_1, window_bounds = array<i64: 8, 96>}, {pipeline_mode = #tpu.pipeline_mode<synchronous>, transform_indices = @transform_2, window_bounds = array<i64: 8, 1>}, {pipeline_mode = #tpu.pipeline_mode<synchronous>, transform_indices = @transform_3, window_bounds = array<i64: 8, 1>}, {transform_indices = @transform_4, window_bounds = array<i64: 8, 512>}]} {
    %c0_i32 = arith.constant 0 : i32
    %0 = arith.cmpi eq, %arg0, %c0_i32 : i32
    %c0_i32_0 = arith.constant 0 : i32
    %1 = arith.cmpi eq, %arg1, %c0_i32_0 : i32
    %2 = arith.andi %0, %1 : i1
    %3 = arith.extui %2 : i1 to i32
    %c0_i32_1 = arith.constant 0 : i32
    %4 = arith.cmpi ne, %3, %c0_i32_1 : i32
    scf.if %4 {
      %cst = arith.constant 0.000000e+00 : f32
      %11 = vector.broadcast %cst : f32 to vector<8x1xf32>
      %c0 = arith.constant 0 : index
      %c0_5 = arith.constant 0 : index
      %12 = vector.load %arg8[%c0, %c0_5] : memref<8x1xf32, #tpu.memory_space<vmem>>, vector<8x1xf32>
      tpu.vector_store %arg8[%c0, %c0_5], %11 {strides = array<i32>} : memref<8x1xf32, #tpu.memory_space<vmem>>, vector<8x1xf32>,
      %cst_6 = arith.constant 0.000000e+00 : f32
      %13 = vector.broadcast %cst_6 : f32 to vector<8x1xf32>
      %c0_7 = arith.constant 0 : index
      %c0_8 = arith.constant 0 : index
      %14 = vector.load %arg9[%c0_7, %c0_8] : memref<8x1xf32, #tpu.memory_space<vmem>>, vector<8x1xf32>
      tpu.vector_store %arg9[%c0_7, %c0_8], %13 {strides = array<i32>} : memref<8x1xf32, #tpu.memory_space<vmem>>, vector<8x1xf32>,
    } else {
    }
    %c0_i32_2 = arith.constant 0 : i32
    %5 = arith.cmpi eq, %arg0, %c0_i32_2 : i32
    %6 = arith.extui %5 : i1 to i32
    %c0_i32_3 = arith.constant 0 : i32
    %7 = arith.cmpi ne, %6, %c0_i32_3 : i32
    scf.if %7 {
      %c0 = arith.constant 0 : index
      %c0_5 = arith.constant 0 : index
      %11 = vector.load %arg3[%c0, %c0_5] : memref<8x96xbf16, #tpu.memory_space<vmem>>, vector<8x96xbf16>
      %c0_6 = arith.constant 0 : index
      %c0_7 = arith.constant 0 : index
      %12 = vector.load %arg2[%c0_6, %c0_7] : memref<96x512xbf16, #tpu.memory_space<vmem>>, vector<96x512xbf16>
      %cst = arith.constant dense<0.000000e+00> : vector<8x512xf32>
      %13 = tpu.matmul %11, %12, %cst {dimension_numbers = #tpu.dot_dimension_numbers<[1], [0], [0], [1], [0, 0, 1, 1], [], []>} : vector<8x96xbf16>, vector<96x512xbf16>, vector<8x512xf32> -> vector<8x512xf32>
      %14 = arith.index_cast %arg1 : i32 to index
      %c0_8 = arith.constant 0 : index
      %c0_9 = arith.constant 0 : index
      %15 = vector.load %arg7[%14, %c0_8, %c0_9] : memref<1x8x512xf32, #tpu.memory_space<vmem>>, vector<1x8x512xf32>
      %16 = vector.shape_cast %15 : vector<1x8x512xf32> to vector<8x512xf32>
      %17 = vector.shape_cast %13 : vector<8x512xf32> to vector<1x8x512xf32>
      tpu.vector_store %arg7[%14, %c0_8, %c0_9], %17 {strides = array<i32>} : memref<1x8x512xf32, #tpu.memory_space<vmem>>, vector<1x8x512xf32>,
      %c0_10 = arith.constant 0 : index
      %c0_11 = arith.constant 0 : index
      %18 = vector.load %arg8[%c0_10, %c0_11] : memref<8x1xf32, #tpu.memory_space<vmem>>, vector<8x1xf32>
      %cst_12 = arith.constant dense<0.000000e+00> : vector<8xf32>
      %19 = vector.multi_reduction <add>, %13, %cst_12 [1] : vector<8x512xf32> to vector<8xf32>
      %20 = vector.shape_cast %19 : vector<8xf32> to vector<8x1xf32>
      %21 = arith.addf %18, %20 : vector<8x1xf32>
      %c0_13 = arith.constant 0 : index
      %c0_14 = arith.constant 0 : index
      %22 = vector.load %arg8[%c0_13, %c0_14] : memref<8x1xf32, #tpu.memory_space<vmem>>, vector<8x1xf32>
      tpu.vector_store %arg8[%c0_13, %c0_14], %21 {strides = array<i32>} : memref<8x1xf32, #tpu.memory_space<vmem>>, vector<8x1xf32>,
      %c0_15 = arith.constant 0 : index
      %c0_16 = arith.constant 0 : index
      %23 = vector.load %arg9[%c0_15, %c0_16] : memref<8x1xf32, #tpu.memory_space<vmem>>, vector<8x1xf32>
      %24 = arith.mulf %13, %13 : vector<8x512xf32>
      %cst_17 = arith.constant dense<0.000000e+00> : vector<8xf32>
      %25 = vector.multi_reduction <add>, %24, %cst_17 [1] : vector<8x512xf32> to vector<8xf32>
      %26 = vector.shape_cast %25 : vector<8xf32> to vector<8x1xf32>
      %27 = arith.addf %23, %26 : vector<8x1xf32>
      %c0_18 = arith.constant 0 : index
      %c0_19 = arith.constant 0 : index
      %28 = vector.load %arg9[%c0_18, %c0_19] : memref<8x1xf32, #tpu.memory_space<vmem>>, vector<8x1xf32>
      tpu.vector_store %arg9[%c0_18, %c0_19], %27 {strides = array<i32>} : memref<8x1xf32, #tpu.memory_space<vmem>>, vector<8x1xf32>,
    } else {
    }
    %c1_i32 = arith.constant 1 : i32
    %8 = arith.cmpi eq, %arg0, %c1_i32 : i32
    %9 = arith.extui %8 : i1 to i32
    %c0_i32_4 = arith.constant 0 : i32
    %10 = arith.cmpi ne, %9, %c0_i32_4 : i32
    scf.if %10 {
      %c0 = arith.constant 0 : index
      %c0_5 = arith.constant 0 : index
      %11 = vector.load %arg8[%c0, %c0_5] : memref<8x1xf32, #tpu.memory_space<vmem>>, vector<8x1xf32>
      %cst = arith.constant 0.001953125 : f32
      %12 = vector.broadcast %cst : f32 to vector<8x1xf32>
      %13 = arith.mulf %11, %12 : vector<8x1xf32>
      %c0_6 = arith.constant 0 : index
      %c0_7 = arith.constant 0 : index
      %14 = vector.load %arg9[%c0_6, %c0_7] : memref<8x1xf32, #tpu.memory_space<vmem>>, vector<8x1xf32>
      %cst_8 = arith.constant 0.001953125 : f32
      %15 = vector.broadcast %cst_8 : f32 to vector<8x1xf32>
      %16 = arith.mulf %14, %15 : vector<8x1xf32>
      %17 = arith.mulf %13, %13 : vector<8x1xf32>
      %18 = arith.subf %16, %17 : vector<8x1xf32>
      %c0_9 = arith.constant 0 : index
      %c0_10 = arith.constant 0 : index
      %19 = vector.load %arg4[%c0_9, %c0_10] : memref<8x1xf32, #tpu.memory_space<vmem>>, vector<8x1xf32>
      %cst_11 = arith.constant 0.000000e+00 : f32
      %20 = vector.broadcast %cst_11 : f32 to vector<8x1xf32>
      %21 = arith.maximumf %18, %20 : vector<8x1xf32>
      %cst_12 = arith.constant 9.99999974E-6 : f32
      %22 = vector.broadcast %cst_12 : f32 to vector<8x1xf32>
      %23 = arith.addf %21, %22 : vector<8x1xf32>
      %24 = math.rsqrt %23 : vector<8x1xf32>
      %25 = arith.mulf %19, %24 : vector<8x1xf32>
      %c0_13 = arith.constant 0 : index
      %c0_14 = arith.constant 0 : index
      %26 = vector.load %arg5[%c0_13, %c0_14] : memref<8x1xf32, #tpu.memory_space<vmem>>, vector<8x1xf32>
      %27 = arith.mulf %25, %13 : vector<8x1xf32>
      %28 = arith.subf %26, %27 : vector<8x1xf32>
      %29 = arith.index_cast %arg1 : i32 to index
      %c0_15 = arith.constant 0 : index
      %c0_16 = arith.constant 0 : index
      %30 = vector.load %arg7[%29, %c0_15, %c0_16] : memref<1x8x512xf32, #tpu.memory_space<vmem>>, vector<1x8x512xf32>
      %31 = vector.shape_cast %30 : vector<1x8x512xf32> to vector<8x512xf32>
      %32 = vector.broadcast %25 : vector<8x1xf32> to vector<8x512xf32>
      %33 = arith.mulf %31, %32 : vector<8x512xf32>
      %34 = vector.broadcast %28 : vector<8x1xf32> to vector<8x512xf32>
      %35 = arith.addf %33, %34 : vector<8x512xf32>
      %cst_17 = arith.constant 0.000000e+00 : f32
      %36 = vector.broadcast %cst_17 : f32 to vector<8x512xf32>
      %37 = arith.cmpf ogt, %35, %36 : vector<8x512xf32>
      %cst_18 = arith.constant 2.000000e-01 : f32
      %38 = vector.broadcast %cst_18 : f32 to vector<8x512xf32>
      %39 = arith.mulf %38, %35 : vector<8x512xf32>
      %40 = arith.select %37, %35, %39 : vector<8x512xi1>, vector<8x512xf32>
      %41 = arith.truncf %40 : vector<8x512xf32> to vector<8x512xbf16>
      %c0_19 = arith.constant 0 : index
      %c0_20 = arith.constant 0 : index
      %42 = vector.load %arg6[%c0_19, %c0_20] : memref<8x512xbf16, #tpu.memory_space<vmem>>, vector<8x512xbf16>
      tpu.vector_store %arg6[%c0_19, %c0_20], %41 {strides = array<i32>} : memref<8x512xbf16, #tpu.memory_space<vmem>>, vector<8x512xbf16>,
    } else {
    }
    return
  }
  func.func @transform_0(%arg0: i32, %arg1: i32) -> (i32, i32) {
    %c1_i32 = arith.constant 1 : i32
    %0 = arith.subi %c1_i32, %arg0 : i32
    %1 = arith.muli %arg1, %0 : i32
    %c0_i32 = arith.constant 0 : i32
    %c0_i32_0 = arith.constant 0 : i32
    return %c0_i32, %1 : i32, i32
  }
  func.func @transform_1(%arg0: i32, %arg1: i32) -> (i32, i32) {
    %c0_i32 = arith.constant 0 : i32
    %c0_i32_0 = arith.constant 0 : i32
    %c0_i32_1 = arith.constant 0 : i32
    return %c0_i32, %c0_i32_0 : i32, i32
  }
  func.func @transform_2(%arg0: i32, %arg1: i32) -> (i32, i32) {
    %c0_i32 = arith.constant 0 : i32
    %c0_i32_0 = arith.constant 0 : i32
    %c0_i32_1 = arith.constant 0 : i32
    return %c0_i32, %c0_i32_0 : i32, i32
  }
  func.func @transform_3(%arg0: i32, %arg1: i32) -> (i32, i32) {
    %c0_i32 = arith.constant 0 : i32
    %c0_i32_0 = arith.constant 0 : i32
    %c0_i32_1 = arith.constant 0 : i32
    return %c0_i32, %c0_i32_0 : i32, i32
  }
  func.func @transform_4(%arg0: i32, %arg1: i32) -> (i32, i32) {
    %0 = arith.muli %arg1, %arg0 : i32
    %c0_i32 = arith.constant 0 : i32
    %c0_i32_0 = arith.constant 0 : i32
    return %c0_i32, %0 : i32, i32
  }
}

module attributes {stable_mosaic.version = 11 : i64} {
  func.func @_fused_conv_bn_lrelu_kernel(%arg0: i32, %arg1: i32, %arg2: memref<128x128xbf16, #tpu.memory_space<vmem>>, %arg3: memref<16x128xbf16, #tpu.memory_space<vmem>>, %arg4: memref<16x1xf32, #tpu.memory_space<vmem>>, %arg5: memref<16x1xf32, #tpu.memory_space<vmem>>, %arg6: memref<16x128xbf16, #tpu.memory_space<vmem>>, %arg7: memref<1x16x128xf32, #tpu.memory_space<vmem>>, %arg8: memref<16x1xf32, #tpu.memory_space<vmem>>, %arg9: memref<16x1xf32, #tpu.memory_space<vmem>>) attributes {dimension_semantics = [#tpu.dimension_semantics<arbitrary>, #tpu.dimension_semantics<arbitrary>], iteration_bounds = array<i64: 2, 1>, scalar_prefetch = 0 : i64, scratch_operands = 3 : i64, tpu.core_type = #tpu.core_type<tc>, window_params = [{transform_indices = @transform_0, window_bounds = array<i64: 128, 128>}, {pipeline_mode = #tpu.pipeline_mode<synchronous>, transform_indices = @transform_1, window_bounds = array<i64: 16, 128>}, {pipeline_mode = #tpu.pipeline_mode<synchronous>, transform_indices = @transform_2, window_bounds = array<i64: 16, 1>}, {pipeline_mode = #tpu.pipeline_mode<synchronous>, transform_indices = @transform_3, window_bounds = array<i64: 16, 1>}, {transform_indices = @transform_4, window_bounds = array<i64: 16, 128>}]} {
    %c0_i32 = arith.constant 0 : i32
    %0 = arith.cmpi eq, %arg0, %c0_i32 : i32
    %c0_i32_0 = arith.constant 0 : i32
    %1 = arith.cmpi eq, %arg1, %c0_i32_0 : i32
    %2 = arith.andi %0, %1 : i1
    %3 = arith.extui %2 : i1 to i32
    %c0_i32_1 = arith.constant 0 : i32
    %4 = arith.cmpi ne, %3, %c0_i32_1 : i32
    scf.if %4 {
      %cst = arith.constant 0.000000e+00 : f32
      %11 = vector.broadcast %cst : f32 to vector<16x1xf32>
      %c0 = arith.constant 0 : index
      %c0_5 = arith.constant 0 : index
      %12 = vector.load %arg8[%c0, %c0_5] : memref<16x1xf32, #tpu.memory_space<vmem>>, vector<16x1xf32>
      tpu.vector_store %arg8[%c0, %c0_5], %11 {strides = array<i32>} : memref<16x1xf32, #tpu.memory_space<vmem>>, vector<16x1xf32>,
      %cst_6 = arith.constant 0.000000e+00 : f32
      %13 = vector.broadcast %cst_6 : f32 to vector<16x1xf32>
      %c0_7 = arith.constant 0 : index
      %c0_8 = arith.constant 0 : index
      %14 = vector.load %arg9[%c0_7, %c0_8] : memref<16x1xf32, #tpu.memory_space<vmem>>, vector<16x1xf32>
      tpu.vector_store %arg9[%c0_7, %c0_8], %13 {strides = array<i32>} : memref<16x1xf32, #tpu.memory_space<vmem>>, vector<16x1xf32>,
    } else {
    }
    %c0_i32_2 = arith.constant 0 : i32
    %5 = arith.cmpi eq, %arg0, %c0_i32_2 : i32
    %6 = arith.extui %5 : i1 to i32
    %c0_i32_3 = arith.constant 0 : i32
    %7 = arith.cmpi ne, %6, %c0_i32_3 : i32
    scf.if %7 {
      %c0 = arith.constant 0 : index
      %c0_5 = arith.constant 0 : index
      %11 = vector.load %arg3[%c0, %c0_5] : memref<16x128xbf16, #tpu.memory_space<vmem>>, vector<16x128xbf16>
      %c0_6 = arith.constant 0 : index
      %c0_7 = arith.constant 0 : index
      %12 = vector.load %arg2[%c0_6, %c0_7] : memref<128x128xbf16, #tpu.memory_space<vmem>>, vector<128x128xbf16>
      %cst = arith.constant dense<0.000000e+00> : vector<16x128xf32>
      %13 = tpu.matmul %11, %12, %cst {dimension_numbers = #tpu.dot_dimension_numbers<[1], [0], [0], [1], [0, 0, 1, 1], [], []>} : vector<16x128xbf16>, vector<128x128xbf16>, vector<16x128xf32> -> vector<16x128xf32>
      %14 = arith.index_cast %arg1 : i32 to index
      %c0_8 = arith.constant 0 : index
      %c0_9 = arith.constant 0 : index
      %15 = vector.load %arg7[%14, %c0_8, %c0_9] : memref<1x16x128xf32, #tpu.memory_space<vmem>>, vector<1x16x128xf32>
      %16 = vector.shape_cast %15 : vector<1x16x128xf32> to vector<16x128xf32>
      %17 = vector.shape_cast %13 : vector<16x128xf32> to vector<1x16x128xf32>
      tpu.vector_store %arg7[%14, %c0_8, %c0_9], %17 {strides = array<i32>} : memref<1x16x128xf32, #tpu.memory_space<vmem>>, vector<1x16x128xf32>,
      %c0_10 = arith.constant 0 : index
      %c0_11 = arith.constant 0 : index
      %18 = vector.load %arg8[%c0_10, %c0_11] : memref<16x1xf32, #tpu.memory_space<vmem>>, vector<16x1xf32>
      %cst_12 = arith.constant dense<0.000000e+00> : vector<16xf32>
      %19 = vector.multi_reduction <add>, %13, %cst_12 [1] : vector<16x128xf32> to vector<16xf32>
      %20 = vector.shape_cast %19 : vector<16xf32> to vector<16x1xf32>
      %21 = arith.addf %18, %20 : vector<16x1xf32>
      %c0_13 = arith.constant 0 : index
      %c0_14 = arith.constant 0 : index
      %22 = vector.load %arg8[%c0_13, %c0_14] : memref<16x1xf32, #tpu.memory_space<vmem>>, vector<16x1xf32>
      tpu.vector_store %arg8[%c0_13, %c0_14], %21 {strides = array<i32>} : memref<16x1xf32, #tpu.memory_space<vmem>>, vector<16x1xf32>,
      %c0_15 = arith.constant 0 : index
      %c0_16 = arith.constant 0 : index
      %23 = vector.load %arg9[%c0_15, %c0_16] : memref<16x1xf32, #tpu.memory_space<vmem>>, vector<16x1xf32>
      %24 = arith.mulf %13, %13 : vector<16x128xf32>
      %cst_17 = arith.constant dense<0.000000e+00> : vector<16xf32>
      %25 = vector.multi_reduction <add>, %24, %cst_17 [1] : vector<16x128xf32> to vector<16xf32>
      %26 = vector.shape_cast %25 : vector<16xf32> to vector<16x1xf32>
      %27 = arith.addf %23, %26 : vector<16x1xf32>
      %c0_18 = arith.constant 0 : index
      %c0_19 = arith.constant 0 : index
      %28 = vector.load %arg9[%c0_18, %c0_19] : memref<16x1xf32, #tpu.memory_space<vmem>>, vector<16x1xf32>
      tpu.vector_store %arg9[%c0_18, %c0_19], %27 {strides = array<i32>} : memref<16x1xf32, #tpu.memory_space<vmem>>, vector<16x1xf32>,
    } else {
    }
    %c1_i32 = arith.constant 1 : i32
    %8 = arith.cmpi eq, %arg0, %c1_i32 : i32
    %9 = arith.extui %8 : i1 to i32
    %c0_i32_4 = arith.constant 0 : i32
    %10 = arith.cmpi ne, %9, %c0_i32_4 : i32
    scf.if %10 {
      %c0 = arith.constant 0 : index
      %c0_5 = arith.constant 0 : index
      %11 = vector.load %arg8[%c0, %c0_5] : memref<16x1xf32, #tpu.memory_space<vmem>>, vector<16x1xf32>
      %cst = arith.constant 7.812500e-03 : f32
      %12 = vector.broadcast %cst : f32 to vector<16x1xf32>
      %13 = arith.mulf %11, %12 : vector<16x1xf32>
      %c0_6 = arith.constant 0 : index
      %c0_7 = arith.constant 0 : index
      %14 = vector.load %arg9[%c0_6, %c0_7] : memref<16x1xf32, #tpu.memory_space<vmem>>, vector<16x1xf32>
      %cst_8 = arith.constant 7.812500e-03 : f32
      %15 = vector.broadcast %cst_8 : f32 to vector<16x1xf32>
      %16 = arith.mulf %14, %15 : vector<16x1xf32>
      %17 = arith.mulf %13, %13 : vector<16x1xf32>
      %18 = arith.subf %16, %17 : vector<16x1xf32>
      %c0_9 = arith.constant 0 : index
      %c0_10 = arith.constant 0 : index
      %19 = vector.load %arg4[%c0_9, %c0_10] : memref<16x1xf32, #tpu.memory_space<vmem>>, vector<16x1xf32>
      %cst_11 = arith.constant 0.000000e+00 : f32
      %20 = vector.broadcast %cst_11 : f32 to vector<16x1xf32>
      %21 = arith.maximumf %18, %20 : vector<16x1xf32>
      %cst_12 = arith.constant 9.99999974E-6 : f32
      %22 = vector.broadcast %cst_12 : f32 to vector<16x1xf32>
      %23 = arith.addf %21, %22 : vector<16x1xf32>
      %24 = math.rsqrt %23 : vector<16x1xf32>
      %25 = arith.mulf %19, %24 : vector<16x1xf32>
      %c0_13 = arith.constant 0 : index
      %c0_14 = arith.constant 0 : index
      %26 = vector.load %arg5[%c0_13, %c0_14] : memref<16x1xf32, #tpu.memory_space<vmem>>, vector<16x1xf32>
      %27 = arith.mulf %25, %13 : vector<16x1xf32>
      %28 = arith.subf %26, %27 : vector<16x1xf32>
      %29 = arith.index_cast %arg1 : i32 to index
      %c0_15 = arith.constant 0 : index
      %c0_16 = arith.constant 0 : index
      %30 = vector.load %arg7[%29, %c0_15, %c0_16] : memref<1x16x128xf32, #tpu.memory_space<vmem>>, vector<1x16x128xf32>
      %31 = vector.shape_cast %30 : vector<1x16x128xf32> to vector<16x128xf32>
      %32 = vector.broadcast %25 : vector<16x1xf32> to vector<16x128xf32>
      %33 = arith.mulf %31, %32 : vector<16x128xf32>
      %34 = vector.broadcast %28 : vector<16x1xf32> to vector<16x128xf32>
      %35 = arith.addf %33, %34 : vector<16x128xf32>
      %cst_17 = arith.constant 0.000000e+00 : f32
      %36 = vector.broadcast %cst_17 : f32 to vector<16x128xf32>
      %37 = arith.cmpf ogt, %35, %36 : vector<16x128xf32>
      %cst_18 = arith.constant 2.000000e-01 : f32
      %38 = vector.broadcast %cst_18 : f32 to vector<16x128xf32>
      %39 = arith.mulf %38, %35 : vector<16x128xf32>
      %40 = arith.select %37, %35, %39 : vector<16x128xi1>, vector<16x128xf32>
      %41 = arith.truncf %40 : vector<16x128xf32> to vector<16x128xbf16>
      %c0_19 = arith.constant 0 : index
      %c0_20 = arith.constant 0 : index
      %42 = vector.load %arg6[%c0_19, %c0_20] : memref<16x128xbf16, #tpu.memory_space<vmem>>, vector<16x128xbf16>
      tpu.vector_store %arg6[%c0_19, %c0_20], %41 {strides = array<i32>} : memref<16x128xbf16, #tpu.memory_space<vmem>>, vector<16x128xbf16>,
    } else {
    }
    return
  }
  func.func @transform_0(%arg0: i32, %arg1: i32) -> (i32, i32) {
    %c1_i32 = arith.constant 1 : i32
    %0 = arith.subi %c1_i32, %arg0 : i32
    %1 = arith.muli %arg1, %0 : i32
    %c0_i32 = arith.constant 0 : i32
    %c0_i32_0 = arith.constant 0 : i32
    return %c0_i32, %1 : i32, i32
  }
  func.func @transform_1(%arg0: i32, %arg1: i32) -> (i32, i32) {
    %c0_i32 = arith.constant 0 : i32
    %c0_i32_0 = arith.constant 0 : i32
    %c0_i32_1 = arith.constant 0 : i32
    return %c0_i32, %c0_i32_0 : i32, i32
  }
  func.func @transform_2(%arg0: i32, %arg1: i32) -> (i32, i32) {
    %c0_i32 = arith.constant 0 : i32
    %c0_i32_0 = arith.constant 0 : i32
    %c0_i32_1 = arith.constant 0 : i32
    return %c0_i32, %c0_i32_0 : i32, i32
  }
  func.func @transform_3(%arg0: i32, %arg1: i32) -> (i32, i32) {
    %c0_i32 = arith.constant 0 : i32
    %c0_i32_0 = arith.constant 0 : i32
    %c0_i32_1 = arith.constant 0 : i32
    return %c0_i32, %c0_i32_0 : i32, i32
  }
  func.func @transform_4(%arg0: i32, %arg1: i32) -> (i32, i32) {
    %0 = arith.muli %arg1, %arg0 : i32
    %c0_i32 = arith.constant 0 : i32
    %c0_i32_0 = arith.constant 0 : i32
    return %c0_i32, %0 : i32, i32
  }
}

</mosaic_0001>

<bundles_post_ra>
// kernel: _lambda_.2
= control target key start
LH: loop header
LB: loop body
LE: loop exit
PB: predicated region body
PF: predicated region fallthrough
CT: control target
= control target key end

     0   :  { %s811_s15 = smov 0   ;;  %s813_s16 = smov 0   ;;  %s930_s0 = inlined_call_operand.vmem [shape: bf16[96,512], index: 0, kind: input, shape index: {}]   ;;  %s931_s1 = inlined_call_operand.vmem [shape: bf16[8,96], index: 1, kind: input, shape index: {}]   ;;  %s932_s2 = inlined_call_operand.vmem [shape: f32[8,1], index: 2, kind: input, shape index: {}]   ;;  %s933_s3 = inlined_call_operand.vmem [shape: f32[8,1], index: 3, kind: input, shape index: {}]   ;;  %s934_s4 = inlined_call_operand.vmem [shape: bf16[8,512], index: 4, kind: output, shape index: {}]  }
   0x1   :  { %s815_s17 = smov 0  }
   0x2 LB: > { %s26_s18 = sadd.s32 1, %s777_s16  ;;  %p654_p0 = scmp.ge.s32.totalorder %s781_s17, 1  ;;  %s781_s17 = sphi %s815_s17, %s14_s17   ;;  %s777_s16 = sphi %s813_s16, %s936_s16   ;;  %s773_s15 = sphi %s811_s15, %s935_s15  }
   0x3   : > { %p28_p1 = scmp.ge.s32.totalorder %s26_s18, 2  ;;  %p185_p2 = scmp.lt.s32.totalorder %s781_s17, 3 }
   0x5   : > { %s938_s18 = smov (%p28_p1, %s26_s18), 0  ;;  %p186_p3 = pnand %p654_p0, %p185_p2 }
   0x6   : > { %p233_p4 = scmp.eq.s32.totalorder (!%p186_p3), %s773_s15, 0 }
   0x7   : > { %189 = sbr.rel (%p186_p3) target bundleno = 586 (0x24a), region = 36 }
   0xe   : > { %238 = sbr.rel (!%p233_p4) target bundleno = 21 (0x15), region = 40  ;;  %vm239_vm0 = vcmask (%p233_p4), 7168   ;;  %v783_v0 = vmov (%p233_p4), 0.0  }
   0xf   : > { %240 = vst.msk [vmem:[#allocation3] sm:$0xff] (%p233_p4), %vm239_vm0, %v783_v0  ;;  %241 = vst.msk [vmem:[#allocation4] sm:$0xff] (%p233_p4), %vm239_vm0, %v783_v0 }
  0x15 PF: > { %p656_p5 = scmp.ne.s32.totalorder %s773_s15, 0 }
  0x16   : > { %v720_v1 = vld [vmem:[%s930_s0 + $0x4] ss:$16 sps:$4 sm:$0xff] (!%p656_p5)   ;;  %v722_v2 = vld [vmem:[%s930_s0 + $0xc] ss:$16 sps:$4 sm:$0xff] (!%p656_p5)   ;;  %v784_v3 = vmov (!%p656_p5), 0   ;;  %vm390_vm1 = vcmask (!%p656_p5), 785408  }
  0x17   : > { %244 = sbr.rel (%p656_p5) target bundleno = 416 (0x1a0), region = 44  ;;  %426 = vmatprep.mubr.bf16.mxu0 (!%p656_p5), %v784_v3  ;;  %467 = vmatprep.mubr.bf16.mxu1 (!%p656_p5), %v784_v3  ;;  %v724_v4 = vld [vmem:[%s930_s0] ss:$16 sps:$4 sm:$0xff] (!%p656_p5)   ;;  %v725_v5 = vld [vmem:[%s930_s0 + $0x8] ss:$16 sps:$4 sm:$0xff] (!%p656_p5)   ;;  %vm490_vm2 = vcmask (!%p656_p5), 7168  }
  0x18   : > { %394 = vmatprep.subr.bf16.mxu0 (!%p656_p5), %v720_v1  ;;  %435 = vmatprep.subr.bf16.mxu1 (!%p656_p5), %v722_v2  ;;  %v726_v6 = vld [vmem:[%s930_s0 + $0x24] ss:$16 sps:$4 sm:$0xff] (!%p656_p5)   ;;  %v728_v7 = vld [vmem:[%s930_s0 + $0x2c] ss:$16 sps:$4 sm:$0xff] (!%p656_p5)   ;;  %v730_v8 = vld [vmem:[%s930_s0 + $0x20] ss:$16 sps:$4 sm:$0xff] (!%p656_p5)  }
  0x19   : > { %395 = vmatpush1.bf16.msra.mxu0 (!%p656_p5), %v724_v4  ;;  %436 = vmatpush1.bf16.msra.mxu1 (!%p656_p5), %v725_v5  ;;  %v731_v9 = vld [vmem:[%s930_s0 + $0x28] ss:$16 sps:$4 sm:$0xff] (!%p656_p5)   ;;  %v732_v10 = vld [vmem:[%s930_s0 + $0x44] ss:$16 sps:$4 sm:$0xff] (!%p656_p5)   ;;  %v734_v11 = vld [vmem:[%s930_s0 + $0x4c] ss:$16 sps:$4 sm:$0xff] (!%p656_p5)  }
  0x1a   : > { %396 = vmatprep.subr.bf16.mxu0 (!%p656_p5), %v726_v6  ;;  %437 = vmatprep.subr.bf16.mxu1 (!%p656_p5), %v728_v7  ;;  %v736_v12 = vld [vmem:[%s930_s0 + $0x40] ss:$16 sps:$4 sm:$0xff] (!%p656_p5)   ;;  %v737_v13 = vld [vmem:[%s930_s0 + $0x48] ss:$16 sps:$4 sm:$0xff] (!%p656_p5)   ;;  %v738_v14 = vld [vmem:[%s930_s0 + $0x64] ss:$16 sps:$4 sm:$0xff] (!%p656_p5)  }
  0x1b   : > { %v740_v15 = vld [vmem:[%s930_s0 + $0x6c] ss:$16 sps:$4 sm:$0xff] (!%p656_p5)   ;;  %v742_v16 = vld [vmem:[%s930_s0 + $0x60] ss:$16 sps:$4 sm:$0xff] (!%p656_p5)   ;;  %v743_v17 = vld [vmem:[%s930_s0 + $0x68] ss:$16 sps:$4 sm:$0xff] (!%p656_p5)  }
  0x1c   : > { %v744_v18 = vld [vmem:[%s930_s0 + $0x84] ss:$16 sps:$4 sm:$0xff] (!%p656_p5)   ;;  %v746_v19 = vld [vmem:[%s930_s0 + $0x8c] ss:$16 sps:$4 sm:$0xff] (!%p656_p5)   ;;  %v748_v20 = vld [vmem:[%s930_s0 + $0x80] ss:$16 sps:$4 sm:$0xff] (!%p656_p5)  }
  0x1d   : > { %397 = vmatpush1.bf16.msra.mxu0 (!%p656_p5), %v730_v8  ;;  %438 = vmatpush1.bf16.msra.mxu1 (!%p656_p5), %v731_v9  ;;  %v749_v21 = vld [vmem:[%s930_s0 + $0x88] ss:$16 sps:$4 sm:$0xff] (!%p656_p5)   ;;  %v750_v22 = vld [vmem:[%s930_s0 + $0xa4] ss:$16 sps:$4 sm:$0xff] (!%p656_p5)   ;;  %v752_v23 = vld [vmem:[%s930_s0 + $0xac] ss:$16 sps:$4 sm:$0xff] (!%p656_p5)  }
  0x1e   : > { %398 = vmatprep.subr.bf16.mxu0 %v732_v10  ;;  %439 = vmatprep.subr.bf16.mxu1 %v734_v11  ;;  %v754_v24 = vld [vmem:[%s930_s0 + $0xa0] ss:$16 sps:$4 sm:$0xff]   ;;  %v755_v25 = vld [vmem:[%s930_s0 + $0xa8] ss:$16 sps:$4 sm:$0xff]  }
  0x1f   : > { %v245_v26 = vld [vmem:[%s931_s1] sm:$0xf]  ;;  %v492_v48 = vld [vmem:[#allocation4] sm:$0xff] }
  0x20   : > { %v483_v45 = vld [vmem:[#allocation3] sm:$0xff] }
  0x21   : > { %399 = vmatpush1.bf16.msra.mxu0 %v736_v12  ;;  %440 = vmatpush1.bf16.msra.mxu1 %v737_v13 }
  0x22   : > { %400 = vmatprep.subr.bf16.mxu0 %v738_v14  ;;  %441 = vmatprep.subr.bf16.mxu1 %v740_v15 }
  0x25   : > { %401 = vmatpush1.bf16.msra.mxu0 %v742_v16  ;;  %442 = vmatpush1.bf16.msra.mxu1 %v743_v17 }
  0x26   : > { %402 = vmatprep.subr.bf16.mxu0 %v744_v18  ;;  %443 = vmatprep.subr.bf16.mxu1 %v746_v19 }
  0x29   : > { %403 = vmatpush1.bf16.msra.mxu0 %v748_v20  ;;  %444 = vmatpush1.bf16.msra.mxu1 %v749_v21 }
  0x2a   : > { %404 = vmatprep.subr.bf16.mxu0 %v750_v22  ;;  %445 = vmatprep.subr.bf16.mxu1 %v752_v23 }
  0x2d   : > { %405 = vmatpush1.bf16.msra.mxu0 %v754_v24  ;;  %446 = vmatpush1.bf16.msra.mxu1 %v755_v25 }
  0x30   : > { %681 = vmatmul.mubr.msk.bf16.vlgmr.msra.gmra.mrb[0].mxu0 %vm390_vm1, %v245_v26  ;;  %682 = vmatmul.mubr.msk.bf16.vlgmr.msra.gmra.mrb[0].mxu1 %vm390_vm1, %v245_v26 }
 0x103   : > { %v428_v27 = vpop.f32.mrb[0].mxu0  ;;  %v469_v28 = vpop.f32.mrb[0].mxu1 }
 0x104   : > { %479 = vst [vmem:[#allocation2] sm:$0xff] %v428_v27  ;;  %v493_v29 = vmul.f32 %v428_v27, %v428_v27  ;;  %481 = vst [vmem:[#allocation2 + $0x10] sm:$0xff] %v469_v28  ;;  %v430_v30 = vpop.f32.mrb[1].mxu0  ;;  %v471_v31 = vpop.f32.mrb[1].mxu1  ;;  %v495_v32 = vmul.f32 %v469_v28, %v469_v28 }
 0x105   : > { %480 = vst [vmem:[#allocation2 + $0x8] sm:$0xff] %v430_v30  ;;  %v484_v33 = vadd.f32 %v430_v30, %v428_v27  ;;  %v494_v34 = vmul.f32 %v430_v30, %v430_v30  ;;  %482 = vst [vmem:[#allocation2 + $0x18] sm:$0xff] %v471_v31  ;;  %v432_v35 = vpop.f32.mrb[2].mxu0  ;;  %v473_v36 = vpop.f32.mrb[2].mxu1  ;;  %v496_v42 = vmul.f32 %v471_v31, %v471_v31 }
 0x106   : > { %v433_v37 = vpop.f32.mrb[3].mxu0  ;;  %v474_v38 = vpop.f32.mrb[3].mxu1 }
 0x107   : > { %v485_v39 = vadd.f32 %v484_v33, %v469_v28  ;;  %v497_v40 = vadd.f32 %v494_v34, %v493_v29 }
 0x109   : > { %v486_v41 = vadd.f32 %v485_v39, %v471_v31  ;;  %v498_v43 = vadd.f32 %v497_v40, %v495_v32 }
 0x10b   : > { %487 = vadd.xlane.f32.xlu0 %v486_v41  ;;  %v499_v44 = vadd.f32 %v498_v43, %v496_v42 }
 0x10f   : > { %500 = vadd.xlane.f32.xlu0 %v499_v44 }
 0x198   : > { %v488_v46 = vpop.xlane.xlu0 %487 }
 0x199   : > { %v489_v47 = vadd.f32 %v488_v46, %v483_v45 }
 0x19b   : > { %491 = vst.msk [vmem:[#allocation3] sm:$0xff] %vm490_vm2, %v489_v47 }
 0x19c   : > { %v501_v49 = vpop.xlane.xlu0 %500 }
 0x19d   : > { %v502_v50 = vadd.f32 %v501_v49, %v492_v48 }
 0x19f   : > { %503 = vst.msk [vmem:[#allocation4] sm:$0xff] %vm490_vm2, %v502_v50 }
 0x1a0 PF: > { %p683_p6 = scmp.ne.s32.totalorder %s773_s15, 1 }
 0x1a1   : > { %v785_v53 = vmov (!%p683_p6), 0   ;;  %v514_v60 = vld [vmem:[%s932_s2] sm:$0xff] (!%p683_p6)  ;;  %v526_v4 = vld [vmem:[#allocation2 + $0x8] sm:$0xff] (!%p683_p6)  ;;  %v527_v5 = vld [vmem:[#allocation2 + $0x10] sm:$0xff] (!%p683_p6) }
 0x1a2   : > { %507 = sbr.rel (%p683_p6) target bundleno = 586 (0x24a), region = 48  ;;  %v508_v51 = vld [vmem:[#allocation3] sm:$0xff] (!%p683_p6)  ;;  %756 = vset.pattern.permute.xlu0 (!%p683_p6), %v785_v53  ;;  %v528_v6 = vld [vmem:[#allocation2 + $0x18] sm:$0xff] (!%p683_p6) }
 0x1a3   : > { %v509_v54 = vmul.f32 (!%p683_p6), 0.001953125, %v508_v51  ;;  %v519_v63 = vld [vmem:[%s933_s3] sm:$0xff] (!%p683_p6) }
 0x1a4   : > { %v525_v2 = vld [vmem:[#allocation2] sm:$0xff] (!%p683_p6) }
 0x1a5   : > { %v512_v56 = vmul.f32 (!%p683_p6), %v509_v54, %v509_v54 }
 0x1a6   : > { %v510_v52 = vld [vmem:[#allocation4] sm:$0xff] (!%p683_p6) }
 0x1a7   : > { %v511_v55 = vmul.f32 (!%p683_p6), 0.001953125, %v510_v52 }
 0x1a9   : > { %v513_v57 = vsub.f32 %v511_v55, %v512_v56 }
 0x1ab   : > { %v515_v58 = vmax.f32 %v513_v57, 0.0 }
 0x1ad   : > { %v516_v59 = vadd.f32 1e-05, %v515_v58 }
 0x1af   : > { %757 = vrsqrt.f32 %v516_v59 }
 0x1b9   : > { %v758_v61 = vpop.eup %757 }
 0x1ba   : > { %v518_v62 = vmul.f32 %v758_v61, %v514_v60 }
 0x1bc   : > { %531 = vperm.xlu0 %756, %v518_v62   ;;  %v520_v0 = vmul.f32 %v518_v62, %v509_v54 }
 0x1be   : > { %v521_v1 = vsub.f32 %v519_v63, %v520_v0 }
 0x1c0   : > { %540 = vperm.xlu0 %756, %v521_v1  }
 0x23b   : > { %v532_v3 = vpop.permute.xlu0 %531 }
 0x23c   : > { %v534_v7 = vmul.f32 %v532_v3, %v525_v2  ;;  %v535_v8 = vmul.f32 %v532_v3, %v526_v4  ;;  %v536_v9 = vmul.f32 %v532_v3, %v527_v5  ;;  %v537_v10 = vmul.f32 %v532_v3, %v528_v6 }
 0x23f   : > { %v541_v11 = vpop.permute.xlu0 %540 }
 0x240   : > { %v543_v12 = vadd.f32 %v541_v11, %v534_v7  ;;  %v544_v13 = vadd.f32 %v541_v11, %v535_v8  ;;  %v545_v14 = vadd.f32 %v541_v11, %v536_v9  ;;  %v546_v15 = vadd.f32 %v541_v11, %v537_v10 }
 0x242   : > { %vm547_vm3 = vcmp.gt.f32.partialorder %v543_v12, 0.0  ;;  %vm548_vm4 = vcmp.gt.f32.partialorder %v544_v13, 0.0  ;;  %vm549_vm5 = vcmp.gt.f32.partialorder %v545_v14, 0.0  ;;  %vm550_vm6 = vcmp.gt.f32.partialorder %v546_v15, 0.0 }
 0x243   : > { %v551_v16 = vmul.f32 0.2, %v543_v12  ;;  %v552_v17 = vmul.f32 0.2, %v544_v13  ;;  %v553_v18 = vmul.f32 0.2, %v545_v14 }
 0x244   : > { %v554_v19 = vmul.f32 0.2, %v546_v15 }
 0x245   : > { %v555_v20 = vsel %vm547_vm3, %v543_v12, %v551_v16  ;;  %v556_v21 = vsel %vm548_vm4, %v544_v13, %v552_v17  ;;  %v557_v22 = vsel %vm549_vm5, %v545_v14, %v553_v18 }
 0x246   : > { %v558_v23 = vsel %vm550_vm6, %v546_v15, %v554_v19  ;;  %v691_v24 = vpack.c.bf16 %v556_v21, %v555_v20 }
 0x247   : > { %v692_v25 = vpack.c.bf16 %v558_v23, %v557_v22 }
 0x248   : > { %575 = vst [vmem:[%s934_s4] sm:$0xff] %v691_v24 }
 0x249   : > { %576 = vst [vmem:[%s934_s4 + $0x8] sm:$0xff] %v692_v25 }
 0x24a PF: > { %s14_s17 = sadd.s32 1, %s781_s17   ;;  %s935_s15 = smov %s777_s16 }
 0x24b   : > { %p11_p7 = scmp.ge.s32.totalorder %s14_s17, 4   ;;  %s936_s16 = smov %s938_s18 }
 0x24d   :  { %13 = sbr.rel (!%p11_p7) target bundleno = 2 (0x2), region = 80 }

// kernel: _lambda_.3
= control target key start
LH: loop header
LB: loop body
LE: loop exit
PB: predicated region body
PF: predicated region fallthrough
CT: control target
= control target key end

     0   :  { %s681_s15 = smov 0   ;;  %s683_s16 = smov 0   ;;  %s755_s0 = inlined_call_operand.vmem [shape: bf16[128,128], index: 0, kind: input, shape index: {}]   ;;  %s756_s1 = inlined_call_operand.vmem [shape: bf16[16,128], index: 1, kind: input, shape index: {}]   ;;  %s757_s2 = inlined_call_operand.vmem [shape: f32[16,1], index: 2, kind: input, shape index: {}]   ;;  %s758_s3 = inlined_call_operand.vmem [shape: f32[16,1], index: 3, kind: input, shape index: {}]   ;;  %s759_s4 = inlined_call_operand.vmem [shape: bf16[16,128], index: 4, kind: output, shape index: {}]  }
   0x1   :  { %s685_s17 = smov 0  }
   0x2 LB: > { %s26_s18 = sadd.s32 1, %s646_s16  ;;  %p529_p0 = scmp.ge.s32.totalorder %s650_s17, 1  ;;  %s650_s17 = sphi %s685_s17, %s14_s17   ;;  %s646_s16 = sphi %s683_s16, %s761_s16   ;;  %s642_s15 = sphi %s681_s15, %s760_s15  }
   0x3   : > { %p28_p1 = scmp.ge.s32.totalorder %s26_s18, 2  ;;  %p183_p2 = scmp.lt.s32.totalorder %s650_s17, 3 }
   0x5   : > { %s763_s18 = smov (%p28_p1, %s26_s18), 0  ;;  %p184_p3 = pnand %p529_p0, %p183_p2 }
   0x6   : > { %p225_p4 = scmp.eq.s32.totalorder (!%p184_p3), %s642_s15, 0 }
   0x7   : > { %187 = sbr.rel (%p184_p3) target bundleno = 587 (0x24b), region = 36 }
   0xe   : > { %230 = sbr.rel (!%p225_p4) target bundleno = 21 (0x15), region = 40  ;;  %vm231_vm0 = vcmask (%p225_p4), 7168   ;;  %v652_v0 = vmov (%p225_p4), 0.0  }
   0xf   : > { %232 = vst.msk [vmem:[#allocation3] sm:$0xff] (%p225_p4), %vm231_vm0, %v652_v0  ;;  %233 = vst.msk [vmem:[#allocation3 + $0x8] sm:$0xff] (%p225_p4), %vm231_vm0, %v652_v0 }
  0x10   : > { %234 = vst.msk [vmem:[#allocation4] sm:$0xff] (%p225_p4), %vm231_vm0, %v652_v0  ;;  %235 = vst.msk [vmem:[#allocation4 + $0x8] sm:$0xff] (%p225_p4), %vm231_vm0, %v652_v0 }
  0x15 PF: > { %p531_p5 = scmp.ne.s32.totalorder %s642_s15, 0 }
  0x16   : > { %v613_v1 = vld [vmem:[%s755_s0] sm:$0xff] (!%p531_p5)   ;;  %v653_v2 = vmov (!%p531_p5), 0.0   ;;  %v614_v3 = vld [vmem:[%s755_s0 + $0x8] sm:$0xff] (!%p531_p5)   ;;  %vm654_vm1 = vmmov (!%p531_p5), 0   ;;  %v615_v4 = vld [vmem:[%s755_s0 + $0x10] sm:$0xff] (!%p531_p5)   ;;  %vm364_vm2 = vcmask (!%p531_p5), 7168  }
  0x17   : > { %238 = sbr.rel (%p531_p5) target bundleno = 418 (0x1a2), region = 44  ;;  %565 = vmatprep.subr.bf16.mxu0 (!%p531_p5), %v653_v2  ;;  %581 = vmatprep.mubr.msk.bf16.mxu0 (!%p531_p5), %vm654_vm1, %v653_v2  ;;  %v616_v5 = vld [vmem:[%s755_s0 + $0x18] sm:$0xff] (!%p531_p5)   ;;  %v617_v6 = vld [vmem:[%s755_s0 + $0x20] sm:$0xff] (!%p531_p5)   ;;  %v618_v7 = vld [vmem:[%s755_s0 + $0x28] sm:$0xff] (!%p531_p5)  }
  0x18   : > { %566 = vmatpush3.bf16.msra.mxu0 (!%p531_p5), %v613_v1  ;;  %v619_v8 = vld [vmem:[%s755_s0 + $0x30] sm:$0xff] (!%p531_p5)   ;;  %v620_v9 = vld [vmem:[%s755_s0 + $0x38] sm:$0xff] (!%p531_p5)   ;;  %v621_v10 = vld [vmem:[%s756_s1] sm:$0xff] (!%p531_p5)  }
  0x19   : > { %567 = vmatprep.subr.bf16.mxu0 (!%p531_p5), %v653_v2  ;;  %v356_v17 = vld [vmem:[#allocation3] sm:$0xff] (!%p531_p5)  ;;  %v367_v19 = vld [vmem:[#allocation4] sm:$0xff] (!%p531_p5)  ;;  %v357_v22 = vld [vmem:[#allocation3 + $0x8] sm:$0xff] (!%p531_p5) }
  0x1a   : > { %v368_v25 = vld [vmem:[#allocation4 + $0x8] sm:$0xff] (!%p531_p5) }
  0x1c   : > { %568 = vmatpush3.bf16.msra.mxu0 (!%p531_p5), %v614_v3 }
  0x1d   : > { %569 = vmatprep.subr.bf16.mxu0 (!%p531_p5), %v653_v2 }
  0x20   : > { %570 = vmatpush3.bf16.msra.mxu0 %v615_v4 }
  0x21   : > { %571 = vmatprep.subr.bf16.mxu0 %v653_v2 }
  0x24   : > { %572 = vmatpush3.bf16.msra.mxu0 %v616_v5 }
  0x25   : > { %573 = vmatprep.subr.bf16.mxu0 %v653_v2 }
  0x28   : > { %574 = vmatpush3.bf16.msra.mxu0 %v617_v6 }
  0x29   : > { %575 = vmatprep.subr.bf16.mxu0 %v653_v2 }
  0x2c   : > { %576 = vmatpush3.bf16.msra.mxu0 %v618_v7 }
  0x2d   : > { %577 = vmatprep.subr.bf16.mxu0 %v653_v2 }
  0x30   : > { %578 = vmatpush3.bf16.msra.mxu0 %v619_v8 }
  0x31   : > { %579 = vmatprep.subr.bf16.mxu0 %v653_v2 }
  0x34   : > { %580 = vmatpush3.bf16.msra.mxu0 %v620_v9 }
  0x37   : > { %582 = vmatmul.mubr.bf16.vlgmr.msra.gmra.mrb[0].mxu0 %v621_v10 }
 0x10a   : > { %v345_v11 = vpop.f32.mrb[0].mxu0 }
 0x10b   : > { %354 = vst [vmem:[#allocation2] sm:$0xff] %v345_v11  ;;  %358 = vadd.xlane.f32.xlu0 %v345_v11  ;;  %v583_v12 = vpop.f32.mrb[1].mxu0  ;;  %v369_v13 = vmul.f32 %v345_v11, %v345_v11 }
 0x10c   : > { %v348_v14 = vpop.f32.mrb[2].mxu0 }
 0x10d   : > { %355 = vst [vmem:[#allocation2 + $0x8] sm:$0xff] %v348_v14  ;;  %371 = vadd.xlane.f32.xlu1 %v369_v13  ;;  %v584_v15 = vpop.f32.mrb[3].mxu0  ;;  %v370_v16 = vmul.f32 %v348_v14, %v348_v14 }
 0x10f   : > { %360 = vadd.xlane.f32.xlu0 %v348_v14 }
 0x111   : > { %373 = vadd.xlane.f32.xlu1 %v370_v16 }
 0x198   : > { %v359_v18 = vpop.xlane.xlu0 %358 }
 0x199   : > { %v362_v20 = vadd.f32 %v359_v18, %v356_v17 }
 0x19a   : > { %v372_v21 = vpop.xlane.xlu1 %371 }
 0x19b   : > { %365 = vst.msk [vmem:[#allocation3] sm:$0xff] %vm364_vm2, %v362_v20  ;;  %v375_v23 = vadd.f32 %v372_v21, %v367_v19 }
 0x19c   : > { %v361_v24 = vpop.xlane.xlu0 %360 }
 0x19d   : > { %377 = vst.msk [vmem:[#allocation4] sm:$0xff] %vm364_vm2, %v375_v23  ;;  %v363_v26 = vadd.f32 %v361_v24, %v357_v22 }
 0x19e   : > { %v374_v27 = vpop.xlane.xlu1 %373 }
 0x19f   : > { %366 = vst.msk [vmem:[#allocation3 + $0x8] sm:$0xff] %vm364_vm2, %v363_v26  ;;  %v376_v28 = vadd.f32 %v374_v27, %v368_v25 }
 0x1a1   : > { %378 = vst.msk [vmem:[#allocation4 + $0x8] sm:$0xff] %vm364_vm2, %v376_v28 }
 0x1a2 PF: > { %p541_p6 = scmp.ne.s32.totalorder %s642_s15, 1 }
 0x1a3   : > { %v383_v29 = vld [vmem:[#allocation3] sm:$0xff] (!%p541_p6)  ;;  %v655_v31 = vmov (!%p541_p6), 0   ;;  %v395_v46 = vld [vmem:[%s757_s2] sm:$0xff] (!%p541_p6)  ;;  %v396_v47 = vld [vmem:[%s757_s2 + $0x8] sm:$0xff] (!%p541_p6) }
 0x1a4   : > { %382 = sbr.rel (%p541_p6) target bundleno = 587 (0x24b), region = 48  ;;  %v387_v30 = vld [vmem:[#allocation4] sm:$0xff] (!%p541_p6)  ;;  %622 = vset.pattern.permute.xlu0 (!%p541_p6), %v655_v31  ;;  %v385_v32 = vmul.f32 (!%p541_p6), 0.0078125, %v383_v29  ;;  %623 = vset.pattern.permute.xlu1 (!%p541_p6), %v655_v31  ;;  %v406_v54 = vld [vmem:[%s758_s3 + $0x8] sm:$0xff] (!%p541_p6) }
 0x1a5   : > { %v389_v33 = vmul.f32 (!%p541_p6), 0.0078125, %v387_v30  ;;  %v405_v52 = vld [vmem:[%s758_s3] sm:$0xff] (!%p541_p6)  ;;  %v414_v61 = vld [vmem:[#allocation2 + $0x8] sm:$0xff] (!%p541_p6) }
 0x1a6   : > { %v384_v34 = vld [vmem:[#allocation3 + $0x8] sm:$0xff] (!%p541_p6)  ;;  %v391_v38 = vmul.f32 (!%p541_p6), %v385_v32, %v385_v32  ;;  %v413_v58 = vld [vmem:[#allocation2] sm:$0xff] (!%p541_p6) }
 0x1a7   : > { %v386_v36 = vmul.f32 (!%p541_p6), 0.0078125, %v384_v34 }
 0x1a8   : > { %v388_v35 = vld [vmem:[#allocation4 + $0x8] sm:$0xff] (!%p541_p6)  ;;  %v393_v40 = vsub.f32 (!%p541_p6), %v389_v33, %v391_v38 }
 0x1a9   : > { %v390_v37 = vmul.f32 (!%p541_p6), 0.0078125, %v388_v35  ;;  %v392_v39 = vmul.f32 (!%p541_p6), %v386_v36, %v386_v36 }
 0x1aa   : > { %v397_v42 = vmax.f32 (!%p541_p6), %v393_v40, 0.0 }
 0x1ab   : > { %v394_v41 = vsub.f32 %v390_v37, %v392_v39 }
 0x1ac   : > { %v399_v44 = vadd.f32 1e-05, %v397_v42 }
 0x1ad   : > { %v398_v43 = vmax.f32 %v394_v41, 0.0 }
 0x1ae   : > { %624 = vrsqrt.f32 %v399_v44 }
 0x1af   : > { %v400_v45 = vadd.f32 1e-05, %v398_v43 }
 0x1b1   : > { %626 = vrsqrt.f32 %v400_v45 }
 0x1b8   : > { %v625_v48 = vpop.eup %624 }
 0x1b9   : > { %v403_v50 = vmul.f32 %v625_v48, %v395_v46 }
 0x1bb   : > { %v627_v49 = vpop.eup %626  ;;  %417 = vperm.xlu0 %622, %v403_v50   ;;  %v407_v53 = vmul.f32 %v403_v50, %v385_v32 }
 0x1bc   : > { %v404_v51 = vmul.f32 %v627_v49, %v396_v47 }
 0x1bd   : > { %v409_v56 = vsub.f32 %v405_v52, %v407_v53 }
 0x1be   : > { %v408_v55 = vmul.f32 %v404_v51, %v386_v36 }
 0x1bf   : > { %422 = vperm.xlu0 %622, %v404_v51   ;;  %429 = vperm.xlu1 %623, %v409_v56  }
 0x1c0   : > { %v410_v57 = vsub.f32 %v406_v54, %v408_v55 }
 0x1c3   : > { %434 = vperm.xlu1 %623, %v410_v57  }
 0x23a   : > { %v418_v59 = vpop.permute.xlu0 %417 }
 0x23b   : > { %v425_v60 = vmul.f32 %v418_v59, %v413_v58 }
 0x23e   : > { %v423_v62 = vpop.permute.xlu0 %422  ;;  %v430_v63 = vpop.permute.xlu1 %429 }
 0x23f   : > { %v437_v0 = vadd.f32 %v430_v63, %v425_v60  ;;  %v426_v1 = vmul.f32 %v423_v62, %v414_v61 }
 0x241   : > { %v441_v3 = vmul.f32 0.2, %v437_v0  ;;  %vm439_vm3 = vcmp.gt.f32.partialorder %v437_v0, 0.0 }
 0x242   : > { %v435_v2 = vpop.permute.xlu1 %434 }
 0x243   : > { %v438_v4 = vadd.f32 %v435_v2, %v426_v1  ;;  %v443_v6 = vsel %vm439_vm3, %v437_v0, %v441_v3 }
 0x245   : > { %vm440_vm4 = vcmp.gt.f32.partialorder %v438_v4, 0.0  ;;  %v442_v5 = vmul.f32 0.2, %v438_v4 }
 0x247   : > { %v444_v7 = vsel %vm440_vm4, %v438_v4, %v442_v5 }
 0x248   : > { %v554_v8 = vpack.c.bf16 %v444_v7, %v443_v6 }
 0x24a   : > { %555 = vst [vmem:[%s759_s4] sm:$0xff] %v554_v8  }
 0x24b PF: > { %s14_s17 = sadd.s32 1, %s650_s17   ;;  %s760_s15 = smov %s646_s16 }
 0x24c   : > { %p11_p7 = scmp.ge.s32.totalorder %s14_s17, 4   ;;  %s761_s16 = smov %s763_s18 }
 0x24e   :  { %13 = sbr.rel (!%p11_p7) target bundleno = 2 (0x2), region = 80 }

</bundles_post_ra>
